<compile_context>
chip_gen: v7x
topology: tpu7x:2x2x1
jax: 0.10.0
libtpu: 0.0.40
codegen_flags: <defaults>
</compile_context>

<pallas_src>
import jax
import jax.numpy as jnp
from jax import lax
from jax.experimental import pallas as pl
from jax.experimental.pallas import tpu as pltpu


# ----------------------------- Pallas kernels ------------------------------ #

def _phi_kernel(p_ref, at_ref, x_ref):
    # signal = p @ A.T == p @ At   (At already stored as (m, n); no in-kernel
    # transpose -> straight MXU push).
    x_ref[...] = jnp.dot(p_ref[...], at_ref[...],
                         preferred_element_type=jnp.float32)


def phi_pallas(p, at, *, tile_b=128):
    """signal = p @ A.T, with A supplied pre-transposed as At: (m, n)."""
    B, m = p.shape
    n = at.shape[1]
    tb = min(tile_b, B)
    return pl.pallas_call(
        _phi_kernel,
        out_shape=jax.ShapeDtypeStruct((B, n), jnp.float32),
        grid=(pl.cdiv(B, tb),),
        in_specs=[pl.BlockSpec((tb, m), lambda i: (i, 0)),
                  pl.BlockSpec((m, n), lambda i: (0, 0))],
        out_specs=pl.BlockSpec((tb, n), lambda i: (i, 0)),
        compiler_params=pltpu.CompilerParams(
            dimension_semantics=("parallel",)),
    )(p, at)


def _bcrb_fims_kernel(cond_ref, kiid_ref, at_ref, pfim_ref,
                      efim_ref, pfim_out_ref, jfim_ref):
    # Fused gram + FIM construction, single grid step.
    at = at_ref[...]                                           # (m, n)
    # gram = A.T @ A : NT-form matmul contracting the lane-dense n axis
    # (no transpose materialized; MXU-native).
    g = lax.dot_general(at, at, (((1,), (1,)), ((), ())),
                        preferred_element_type=jnp.float32)     # (m, m)
    pf = pfim_ref[...]                                          # (m, m)
    k = kiid_ref[0]                                             # SMEM scalar
    C = efim_ref.shape[0]
    for c in range(C):            # static unroll; C is known at trace time
        e = (k * cond_ref[c]) * g                               # efim(c)
        efim_ref[c] = e
        pfim_out_ref[c] = pf
        jfim_ref[c] = e + pf                                    # efim + pfim


def bcrb_fims_pallas(condition_list, k_iid, at, prior_fim):
    """One fused launch producing (efim, pfim, efim+pfim) for every condition."""
    cond = jnp.reshape(jnp.asarray(condition_list, jnp.float32), (-1,))
    kiid = jnp.reshape(jnp.asarray(k_iid, jnp.float32), (1,))
    C = cond.shape[0]
    m, n = at.shape
    out_sds = jax.ShapeDtypeStruct((C, m, m), jnp.float32)
    out_spec = pl.BlockSpec((C, m, m), lambda i: (0, 0, 0))
    # TODO(synk): for very large n, tile the gram reduction over n instead of
    # holding the full (m, n) At block in VMEM.
    return pl.pallas_call(
        _bcrb_fims_kernel,
        out_shape=(out_sds, out_sds, out_sds),
        grid=(1,),
        in_specs=[pl.BlockSpec(memory_space=pltpu.SMEM),        # conditions
                  pl.BlockSpec(memory_space=pltpu.SMEM),        # k_iid
                  pl.BlockSpec((m, n), lambda i: (0, 0)),       # At (m, n)
                  pl.BlockSpec((m, m), lambda i: (0, 0))],      # prior FIM
        out_specs=(out_spec, out_spec, out_spec),
        compiler_params=pltpu.CompilerParams(
            dimension_semantics=("arbitrary",)),
    )(cond, kiid, at, prior_fim)


# ------------------------------ JAX glue ----------------------------------- #

def _spd_inv(mats):
    """Inverse of a batch of SPD matrices via Cholesky (robust vs generic LU)."""
    m = mats.shape[-1]
    eye = jnp.broadcast_to(jnp.eye(m, dtype=mats.dtype), mats.shape)
    chol = jnp.linalg.cholesky(mats)                      # lower, batched
    y = lax.linalg.triangular_solve(chol, eye, left_side=True, lower=True)
    return lax.linalg.triangular_solve(chol, y, left_side=True, lower=True,
                                       transpose_a=True)


# --------------------------- Problem wrapper -------------------------------- #

class BaseProblemPallas:
    """Linear-Gaussian instantiation of BaseProblem with a fused Pallas path."""

    def __init__(self, n, m, k, condition_list, prior_precision=1.0):
        self.n, self.m, self.k = n, m, k
        self.is_complex = False
        self.has_bcrb = True
        self.has_score = False
        key = jax.random.PRNGKey(0)
        # Deterministic "measurement matrix" parameter A: (n, m).
        self.A = jax.random.normal(key, (n, m), dtype=jnp.float32) / jnp.sqrt(
            jnp.float32(n))
        # Lane-dense copy (m, n): measurements on the 128-lane axis.  Every
        # kernel consumes this layout; no in-kernel transposes.
        self.At = jnp.asarray(self.A.T)
        self.condition_list = jnp.asarray(condition_list, dtype=jnp.float32)
        self.prior_fim = prior_precision * jnp.eye(m, dtype=jnp.float32)
        self.one = jnp.ones((1,), dtype=jnp.float32)

    # --- model information ---
    def phi(self, p):
        return phi_pallas(p, self.At)

    def dphidtheta(self, p):
        # Jacobian of the linear model is parameter-independent; return a
        # broadcastable (1, n, m) view rather than materializing B copies.
        del p
        return self.A[None, :, :]

    def get_condition_list(self):
        return self.condition_list

    # --- FIM / BCRB path: a single fused Pallas launch per call ---
    def get_prior_fim(self):
        return self.prior_fim

    def _fims(self, conditions, k_iid):
        return bcrb_fims_pallas(conditions, k_iid, self.At, self.prior_fim)

    def get_expected_likelihood_fim(self, snr, k_iid):
        efim, _, _ = self._fims(
            jnp.reshape(jnp.asarray(snr, jnp.float32), (1,)), k_iid)
        return efim[0]

    def bcrb(self, snr, k_iid=None):
        if k_iid is None:
            k_iid = self.k
        efim, pfim, jfim = self._fims(
            jnp.reshape(jnp.asarray(snr, jnp.float32), (1,)), k_iid)
        # m x m SPD inverse has no Pallas linalg primitive; tiny Cholesky solve
        # in plain JAX (not the hot path).
        return _spd_inv(jfim)[0], efim[0], pfim[0]

    def bcrb_vs_condition(self):
        efim, pfim, jfim = self._fims(self.condition_list, self.k)
        bcrb = _spd_inv(jfim)
        # torch.stack(torch.stack(self.bcrb(c))) -> [C, 3, m, m]
        return jnp.stack([bcrb, efim, pfim], axis=1)

    # TODO(synk): save_model / load_model (file I/O) and the optimal score
    # functions (defined only by concrete subclasses) are intentionally omitted.


# --------------------------------- main ------------------------------------- #

if __name__ == "__main__":
    N, M, K_IID, BATCH = 128, 8, 4, 2
    conditions = jnp.array([0.5, 1.0, 2.0, 4.0], dtype=jnp.float32)

    problem = BaseProblemPallas(N, M, K_IID, conditions)

    # phi forward (ModelInformation.forward)
    p = jax.random.normal(jax.random.PRNGKey(1), (BATCH, M), dtype=jnp.float32)
    signal = jax.block_until_ready(problem.phi(p))

    # bcrb_vs_condition forward (fused gram+FIM kernel, single launch)
    out = jax.block_until_ready(problem.bcrb_vs_condition())   # (C, 3, m, m)

    # single-condition bcrb path (exercises SMEM k_iid / snr scalars)
    inv0, e0, pf0 = problem.bcrb(2.0)
    jax.block_until_ready(inv0)

    # Reference check in plain JAX.
    A = problem.A
    ref_signal = p @ A.T
    ref_gram = A.T @ A
    ref_efim = K_IID * conditions[:, None, None] * ref_gram[None]
    ref_pfim = jnp.broadcast_to(problem.prior_fim, ref_efim.shape)
    ref_out = jnp.stack(
        [jnp.linalg.inv(ref_efim + ref_pfim), ref_efim, ref_pfim], axis=1)

    assert signal.shape == (BATCH, N)
    assert out.shape == (conditions.shape[0], 3, M, M)
    assert jnp.allclose(signal, ref_signal, atol=1e-5, rtol=1e-5)
    assert jnp.allclose(out, ref_out, atol=1e-4, rtol=1e-4)
    assert jnp.allclose(e0, K_IID * 2.0 * ref_gram, atol=1e-4, rtol=1e-4)
    assert jnp.allclose(inv0, jnp.linalg.inv(e0 + pf0), atol=1e-4, rtol=1e-4)

    print("KERNEL_OK")
</pallas_src>

<mosaic_0001>
module attributes {stable_mosaic.version = 11 : i64} {
  func.func @_phi_kernel(%arg0: i32, %arg1: memref<2x8xf32, #tpu.memory_space<vmem>>, %arg2: memref<8x128xf32, #tpu.memory_space<vmem>>, %arg3: memref<2x128xf32, #tpu.memory_space<vmem>>) attributes {dimension_semantics = [#tpu.dimension_semantics<parallel>], iteration_bounds = array<i64: 1>, scalar_prefetch = 0 : i64, scratch_operands = 0 : i64, tpu.core_type = #tpu.core_type<tc>, window_params = [{transform_indices = @transform_0, window_bounds = array<i64: 2, 8>}, {pipeline_mode = #tpu.pipeline_mode<synchronous>, transform_indices = @transform_1, window_bounds = array<i64: 8, 128>}, {transform_indices = @transform_2, window_bounds = array<i64: 2, 128>}]} {
    %c0 = arith.constant 0 : index
    %c0_0 = arith.constant 0 : index
    %0 = vector.load %arg1[%c0, %c0_0] : memref<2x8xf32, #tpu.memory_space<vmem>>, vector<2x8xf32>
    %c0_1 = arith.constant 0 : index
    %c0_2 = arith.constant 0 : index
    %1 = vector.load %arg2[%c0_1, %c0_2] : memref<8x128xf32, #tpu.memory_space<vmem>>, vector<8x128xf32>
    %cst = arith.constant dense<0.000000e+00> : vector<2x128xf32>
    %2 = tpu.matmul %0, %1, %cst {dimension_numbers = #tpu.dot_dimension_numbers<[1], [0], [0], [1], [0, 0, 1, 1], [], []>} : vector<2x8xf32>, vector<8x128xf32>, vector<2x128xf32> -> vector<2x128xf32>
    %c0_3 = arith.constant 0 : index
    %c0_4 = arith.constant 0 : index
    %3 = vector.load %arg3[%c0_3, %c0_4] : memref<2x128xf32, #tpu.memory_space<vmem>>, vector<2x128xf32>
    tpu.vector_store %arg3[%c0_3, %c0_4], %2 {strides = array<i32>} : memref<2x128xf32, #tpu.memory_space<vmem>>, vector<2x128xf32>,
    return
  }
  func.func @transform_0(%arg0: i32) -> (i32, i32) {
    %c0_i32 = arith.constant 0 : i32
    %c0_i32_0 = arith.constant 0 : i32
    return %arg0, %c0_i32 : i32, i32
  }
  func.func @transform_1(%arg0: i32) -> (i32, i32) {
    %c0_i32 = arith.constant 0 : i32
    %c0_i32_0 = arith.constant 0 : i32
    %c0_i32_1 = arith.constant 0 : i32
    return %c0_i32, %c0_i32_0 : i32, i32
  }
  func.func @transform_2(%arg0: i32) -> (i32, i32) {
    %c0_i32 = arith.constant 0 : i32
    %c0_i32_0 = arith.constant 0 : i32
    return %arg0, %c0_i32 : i32, i32
  }
}

</mosaic_0001>

<bundles_post_ra>
// kernel: tpu_custom_call.1
= control target key start
LH: loop header
LB: loop body
LE: loop exit
PB: predicated region body
PF: predicated region fallthrough
CT: control target
= control target key end

     0   :  { %7 = vsyncpa [#allocation3], 0  ;;  %s270_s0 = inlined_call_operand.hbm [shape: f32[2,8], index: 0, kind: input, shape index: {}]   ;;  %s271_s1 = inlined_call_operand.hbm [shape: f32[8,128], index: 1, kind: input, shape index: {}]   ;;  %s272_s2 = inlined_call_operand.hbm [shape: f32[2,128], index: 2, kind: output, shape index: {}]  }
   0x1   :  { %8 = vsyncpa [#allocation6], 0 }
   0x2   :  { %9 = vsyncpa [#allocation4], 0  ;;  %s214_s9 = smov [#allocation2]   ;;  %s215_s11 = smov [#allocation5]  }
   0x3   :  { %s16_s10 = sshll.u32 %s214_s9, 4  ;;  %s26_s12 = sshll.u32 %s215_s11, 4  ;;  %s17_s10 = int_to_ptr.vmem [resolvable:$true] %s16_s10  ;;  %s27_s12 = int_to_ptr.vmem [resolvable:$true] %s26_s12 }
   0x4   :  { %s142_s15 = scalar_lea.hbm %s270_s0, 32 }
   0x5   :  { %p143_p0 = scmp.ne.s32.totalorder %s270_s0, %s142_s15  ;;  %p146_p1 = scmp.lt.u32.totalorder %s142_s15, %s270_s0 }
   0x7   :  { %p148_p2 = pnand %p146_p1, %p143_p0 }
   0x9   :  { %151 = shalt.err (!%p148_p2)
}
   0xa   :  { %s152_s20 = scalar_lea.vmem %s17_s10, 32  ;;  %p157_p4 = scmp.lt.s32.totalorder %s17_s10, %s17_s10 }
   0xb   :  { %p153_p3 = scmp.ne.s32.totalorder %s17_s10, %s152_s20  ;;  %p158_p5 = scmp.lt.s32.totalorder %s152_s20, %s152_s20 }
   0xd   :  { %p159_p6 = por %p158_p5, %p157_p4 }
   0xf   :  { %p160_p7 = pnand %p159_p6, %p153_p3 }
  0x11   :  { %163 = shalt.err (!%p160_p7)
}
  0x12   :  { %19 = dma.hbm_to_vmem [thread:$0]  %s270_s0, 32, %s17_s10, [#allocation3]  }
  0x13   :  { %s164_s25 = scalar_lea.hbm %s271_s1, 128 }
  0x14   :  { %p165_p8 = scmp.ne.s32.totalorder %s271_s1, %s164_s25  ;;  %p168_p9 = scmp.lt.u32.totalorder %s164_s25, %s271_s1 }
  0x16   :  { %p170_p10 = pnand %p168_p9, %p165_p8 }
  0x18   :  { %173 = shalt.err (!%p170_p10)
}
  0x19   :  { %s174_s30 = scalar_lea.vmem %s27_s12, 128  ;;  %p179_p12 = scmp.lt.s32.totalorder %s27_s12, %s27_s12 }
  0x1a   :  { %p175_p11 = scmp.ne.s32.totalorder %s27_s12, %s174_s30  ;;  %p180_p13 = scmp.lt.s32.totalorder %s174_s30, %s174_s30 }
  0x1c   :  { %p181_p0 = por %p180_p13, %p179_p12 }
  0x1e   :  { %p182_p1 = pnand %p181_p0, %p175_p11 }
  0x20   :  { %185 = shalt.err (!%p182_p1)
}
  0x21   :  { %29 = dma.hbm_to_vmem [thread:$0]  %s271_s1, 128, %s27_s12, [#allocation6]  }
  0x22   :  { %208 = dma.done.wait [#allocation3], 32  }
  0x23   :  { %209 = vsyncadd [#allocation3], 4294967264 }
  0x24   :  { %210 = dma.done.wait [#allocation6], 128  }
  0x25   :  { %211 = vsyncadd [#allocation6], 4294967168  ;;  %v216_v0 = vmov 0.0   ;;  %vm217_vm0 = vmmov 0   ;;  %vm38_vm1 = vcmask 64512   ;;  %v37_v1 = vld [vmem:[#allocation5] sm:$0xff] }
  0x26   :  { %132 = vmatprep.subr.mxu0 %v216_v0  ;;  %134 = vmatprep.mubr.msk.f32.mxu0 %vm217_vm0, %v216_v0  ;;  %v36_v2 = vld [vmem:[#allocation2] sm:$0x3]  ;;  %s218_s4 = smov [#allocation7]  }
  0x27   :  { %133 = vmatpush3.msra.mxu0 %v37_v1  ;;  %s119_s5 = sshll.u32 %s218_s4, 4  ;;  %s120_s5 = int_to_ptr.vmem [resolvable:$true] %s119_s5 }
  0x28   :  { %135 = vmatmul.mubr.msk.f32.vlgmr.msra.gmra.mrb[0].mxu0 %vm38_vm1, %v36_v2  ;;  %s186_s1 = scalar_lea.vmem %s120_s5, 32  ;;  %p191_p3 = scmp.lt.s32.totalorder %s120_s5, %s120_s5 }
  0x29   :  { %p187_p2 = scmp.ne.s32.totalorder %s120_s5, %s186_s1  ;;  %p192_p4 = scmp.lt.s32.totalorder %s186_s1, %s186_s1 }
  0x2b   :  { %p193_p5 = por %p192_p4, %p191_p3 }
  0x2d   :  { %p194_p6 = pnand %p193_p5, %p187_p2 }
  0xfb   :  { %v108_v3 = vpop.f32.mrb[0].mxu0 }
  0xfc   :  { %112 = vst [vmem:[#allocation7] sm:$0x3] %v108_v3  ;;  %v136_v4 = vpop.f32.mrb[1].mxu0 }
  0xfd   :  { %197 = shalt.err (!%p194_p6)
}
  0xfe   :  { %s198_s8 = scalar_lea.hbm %s272_s2, 32 }
  0xff   :  { %p199_p7 = scmp.ne.s32.totalorder %s272_s2, %s198_s8  ;;  %p202_p8 = scmp.lt.u32.totalorder %s198_s8, %s272_s2 }
 0x101   :  { %p204_p9 = pnand %p202_p8, %p199_p7 }
 0x103   :  { %207 = shalt.err (!%p204_p9)
}
 0x104   :  { %122 = dma.vmem_to_hbm [thread:$0]  %s120_s5, 32, %s272_s2, [#allocation4]  }
 0x105   :  { %212 = dma.done.wait [#allocation4], 32  }
 0x106   :  { %213 = vsyncadd [#allocation4], 4294967264 }
 0x107   :  { %126 = vsyncpa [#allocation3], 1 }
 0x108   :  { %127 = vsyncpa [#allocation6], 1 }
 0x109   :  { %128 = vsyncpa [#allocation4], 1 }

</bundles_post_ra>
